<compile_context>
chip_gen: v6e
topology: v6e:2x2x1
jax: 0.10.0
libtpu: 0.0.40
codegen_flags: <defaults>
</compile_context>

<pallas_src>
import jax
import jax.numpy as jnp
from jax.experimental import pallas as pl
from jax.experimental.pallas import tpu as pltpu

NUM_CLASSES = 2
BASE_FEATURES = 1000                      # base_model output dim, eaten by fc
LANE = 128                                # class dim padded to a multiple of this
SUBLANE = 8
VMEM_SIZING_BUDGET = 36 * 1024 * 1024     # target working set (fits every gen)
VMEM_LIMIT_BYTES = 48 * 1024 * 1024       # scoped-VMEM limit handed to Mosaic


def _round_up(a, m):
    return ((a + m - 1) // m) * m


def classifier_kernel(x_ref, w_ref, b_ref, out_ref):
    # x_ref  : (TB, C, HW)  activation tile (f32 or bf16), pipelined over batch
    # w_ref  : (C, N_PAD)   fused (base-head @ fc) weight, f32, grid-invariant
    # b_ref  : (1, N_PAD)   fused bias, f32, grid-invariant
    # out_ref: (TB, N_PAD)  f32 logits
    x = x_ref[...].astype(jnp.float32)
    pooled = jnp.mean(x, axis=-1)                                   # GAP (XLU)
    logits = jnp.dot(pooled, w_ref[...],
                     preferred_element_type=jnp.float32)            # MXU
    out_ref[...] = logits + b_ref[...]


def fold_classifier_params(w_base, b_base, w_fc, b_fc, num_classes=NUM_CLASSES):
    """Fold (1000-way head) @ (fc) once per weight set; cache and reuse."""
    f32 = jnp.float32
    w_eff = jnp.dot(w_base.astype(f32), w_fc.astype(f32))            # (C, num_classes)
    b_eff = jnp.dot(b_base.astype(f32), w_fc.astype(f32)) + b_fc.astype(f32)
    c = w_eff.shape[0]
    n_pad = _round_up(max(num_classes, 1), LANE)
    w_eff_p = jnp.zeros((c, n_pad), f32).at[:, :num_classes].set(w_eff)
    b_eff_p = jnp.zeros((1, n_pad), f32).at[:, :num_classes].set(b_eff)
    return w_eff_p, b_eff_p


def classifier_forward(x_nchw, w_eff_p, b_eff_p, *, num_classes=NUM_CLASSES, tb=256):
    """x_nchw: (B, C, H, W) activations (supply bf16 to halve HBM traffic).
    w_eff_p, b_eff_p: outputs of fold_classifier_params (precomputed/cached).
    Returns fp32 logits of shape (B, num_classes)."""
    B, C, H, W = x_nchw.shape
    HW = H * W
    n_pad = w_eff_p.shape[1]
    x3 = x_nchw.reshape(B, C, HW)          # free reshape (row-major contiguous)
    x_item = jnp.dtype(x3.dtype).itemsize

    def working_set_bytes(t):
        # double-buffered x + out tiles, plus (double-buffered) weight & bias
        return (2 * t * C * HW * x_item
                + 2 * t * n_pad * 4
                + 2 * (C * n_pad * 4 + SUBLANE * n_pad * 4))

    # ---- batch tile selection ----------------------------------------------
    if B <= SUBLANE:
        tb = B                              # single exact tile; zero padding
    else:
        tb = max(SUBLANE, (int(tb) // SUBLANE) * SUBLANE)     # multiple of 8
        b8 = _round_up(B, SUBLANE)
        tb = min(tb, b8)
        if pl.cdiv(B, tb) < 2:              # >= 2 grid steps -> both v7x TCs busy
            tb = max(SUBLANE, _round_up(pl.cdiv(b8, 2), SUBLANE))
        while tb > SUBLANE and working_set_bytes(tb) > VMEM_SIZING_BUDGET:
            tb = max(SUBLANE, (tb // 2 // SUBLANE) * SUBLANE)
        # TODO(synk): for extreme C*HW where even tb=8 exceeds VMEM, also tile
        # HW and accumulate the partial mean in a scratch (not needed here).

    num_tiles = pl.cdiv(B, tb)
    b_pad = num_tiles * tb                  # output over-allocation only; x untouched
    vmem_limit = max(VMEM_LIMIT_BYTES, working_set_bytes(tb) + (4 << 20))

    cost = pl.CostEstimate(
        flops=2 * b_pad * C * n_pad + b_pad * C * HW,
        transcendentals=0,
        bytes_accessed=(B * C * HW * x_item + C * n_pad * 4 + n_pad * 4
                        + b_pad * n_pad * 4),
    )

    out = pl.pallas_call(
        classifier_kernel,
        out_shape=jax.ShapeDtypeStruct((b_pad, n_pad), jnp.float32),
        grid=(num_tiles,),
        in_specs=[
            pl.BlockSpec((tb, C, HW), lambda i: (i, 0, 0)),   # x: pipelined over batch
            pl.BlockSpec((C, n_pad), lambda i: (0, 0)),       # weight: resident
            pl.BlockSpec((1, n_pad), lambda i: (0, 0)),       # bias: resident
        ],
        out_specs=pl.BlockSpec((tb, n_pad), lambda i: (i, 0)),
        compiler_params=pltpu.CompilerParams(
            dimension_semantics=("parallel",),
            vmem_limit_bytes=int(vmem_limit),
        ),
        cost_estimate=cost,
    )(x3, w_eff_p, b_eff_p)

    return out[:B, :num_classes]


def reference_forward(x_nchw, w_base, b_base, w_fc, b_fc):
    B, C = x_nchw.shape[0], x_nchw.shape[1]
    feats_in = jnp.mean(x_nchw.reshape(B, C, -1), axis=-1)
    feats = feats_in @ w_base + b_base
    return feats @ w_fc + b_fc


if __name__ == "__main__":
    key = jax.random.PRNGKey(0)
    k_x, k_wb, k_bb, k_wf, k_bf = jax.random.split(key, 5)

    # Small shapes consistent with an image-classifier input.
    B, C, H, W = 2, 4, 16, 16
    x = jax.random.normal(k_x, (B, C, H, W), dtype=jnp.float32)

    # Deterministic synthetic parameters (no checkpoint loading).
    w_base = jax.random.normal(k_wb, (C, BASE_FEATURES), dtype=jnp.float32) * 0.05
    b_base = jax.random.normal(k_bb, (BASE_FEATURES,), dtype=jnp.float32) * 0.02
    w_fc = jax.random.normal(k_wf, (BASE_FEATURES, NUM_CLASSES), dtype=jnp.float32) * 0.05
    b_fc = jax.random.normal(k_bf, (NUM_CLASSES,), dtype=jnp.float32) * 0.02

    # One-time fold (cache this per weight set in real use).
    w_eff_p, b_eff_p = fold_classifier_params(w_base, b_base, w_fc, b_fc)

    ref = reference_forward(x, w_base, b_base, w_fc, b_fc)

    # fp32 activations.
    out = jax.block_until_ready(classifier_forward(x, w_eff_p, b_eff_p))
    assert out.shape == (B, NUM_CLASSES)
    assert jnp.allclose(out, ref, atol=1e-3, rtol=1e-3), "f32 mismatch vs reference"

    # bf16 activations (recommended deployment path: halves HBM traffic).
    out_bf16 = jax.block_until_ready(
        classifier_forward(x.astype(jnp.bfloat16), w_eff_p, b_eff_p))
    assert jnp.allclose(out_bf16, ref, atol=1e-2, rtol=1e-2), "bf16 mismatch vs reference"

    print("KERNEL_OK")
</pallas_src>

<mosaic_0001>
module attributes {stable_mosaic.version = 11 : i64} {
  func.func @classifier_kernel(%arg0: i32, %arg1: memref<2x4x256xf32, #tpu.memory_space<vmem>>, %arg2: memref<4x128xf32, #tpu.memory_space<vmem>>, %arg3: memref<1x128xf32, #tpu.memory_space<vmem>>, %arg4: memref<2x128xf32, #tpu.memory_space<vmem>>) attributes {dimension_semantics = [#tpu.dimension_semantics<parallel>], iteration_bounds = array<i64: 1>, scalar_prefetch = 0 : i64, scratch_operands = 0 : i64, tpu.core_type = #tpu.core_type<tc>, window_params = [{transform_indices = @transform_0, window_bounds = array<i64: 2, 4, 256>}, {pipeline_mode = #tpu.pipeline_mode<synchronous>, transform_indices = @transform_1, window_bounds = array<i64: 4, 128>}, {pipeline_mode = #tpu.pipeline_mode<synchronous>, transform_indices = @transform_2, window_bounds = array<i64: 1, 128>}, {transform_indices = @transform_3, window_bounds = array<i64: 2, 128>}]} {
    %c0 = arith.constant 0 : index
    %c0_0 = arith.constant 0 : index
    %c0_1 = arith.constant 0 : index
    %0 = vector.load %arg1[%c0, %c0_0, %c0_1] : memref<2x4x256xf32, #tpu.memory_space<vmem>>, vector<2x4x256xf32>
    %cst = arith.constant dense<0.000000e+00> : vector<2x4xf32>
    %1 = vector.multi_reduction <add>, %0, %cst [2] : vector<2x4x256xf32> to vector<2x4xf32>
    %cst_2 = arith.constant 2.560000e+02 : f32
    %2 = vector.broadcast %cst_2 : f32 to vector<2x4xf32>
    %3 = arith.divf %1, %2 : vector<2x4xf32>
    %c0_3 = arith.constant 0 : index
    %c0_4 = arith.constant 0 : index
    %4 = vector.load %arg2[%c0_3, %c0_4] : memref<4x128xf32, #tpu.memory_space<vmem>>, vector<4x128xf32>
    %cst_5 = arith.constant dense<0.000000e+00> : vector<2x128xf32>
    %5 = tpu.matmul %3, %4, %cst_5 {dimension_numbers = #tpu.dot_dimension_numbers<[1], [0], [0], [1], [0, 0, 1, 1], [], []>} : vector<2x4xf32>, vector<4x128xf32>, vector<2x128xf32> -> vector<2x128xf32>
    %c0_6 = arith.constant 0 : index
    %c0_7 = arith.constant 0 : index
    %6 = vector.load %arg3[%c0_6, %c0_7] : memref<1x128xf32, #tpu.memory_space<vmem>>, vector<1x128xf32>
    %7 = vector.broadcast %6 : vector<1x128xf32> to vector<2x128xf32>
    %8 = arith.addf %5, %7 : vector<2x128xf32>
    %c0_8 = arith.constant 0 : index
    %c0_9 = arith.constant 0 : index
    %9 = vector.load %arg4[%c0_8, %c0_9] : memref<2x128xf32, #tpu.memory_space<vmem>>, vector<2x128xf32>
    tpu.vector_store %arg4[%c0_8, %c0_9], %8 {strides = array<i32>} : memref<2x128xf32, #tpu.memory_space<vmem>>, vector<2x128xf32>,
    return
  }
  func.func @transform_0(%arg0: i32) -> (i32, i32, i32) {
    %c0_i32 = arith.constant 0 : i32
    %c0_i32_0 = arith.constant 0 : i32
    %c0_i32_1 = arith.constant 0 : i32
    return %arg0, %c0_i32, %c0_i32_0 : i32, i32, i32
  }
  func.func @transform_1(%arg0: i32) -> (i32, i32) {
    %c0_i32 = arith.constant 0 : i32
    %c0_i32_0 = arith.constant 0 : i32
    %c0_i32_1 = arith.constant 0 : i32
    return %c0_i32, %c0_i32_0 : i32, i32
  }
  func.func @transform_2(%arg0: i32) -> (i32, i32) {
    %c0_i32 = arith.constant 0 : i32
    %c0_i32_0 = arith.constant 0 : i32
    %c0_i32_1 = arith.constant 0 : i32
    return %c0_i32, %c0_i32_0 : i32, i32
  }
  func.func @transform_3(%arg0: i32) -> (i32, i32) {
    %c0_i32 = arith.constant 0 : i32
    %c0_i32_0 = arith.constant 0 : i32
    return %arg0, %c0_i32 : i32, i32
  }
}

</mosaic_0001>

<bundles_post_ra>
// kernel: tpu_custom_call.1
= control target key start
LH: loop header
LB: loop body
LE: loop exit
PB: predicated region body
PF: predicated region fallthrough
CT: control target
= control target key end

     0   :  { %8 = vsyncpa [#allocation3], 0  ;;  %s307_s0 = inlined_call_operand.hbm [shape: f32[2,4,256], index: 0, kind: input, shape index: {}]   ;;  %s308_s1 = inlined_call_operand.hbm [shape: f32[4,128], index: 1, kind: input, shape index: {}]   ;;  %s309_s2 = inlined_call_operand.vmem [shape: f32[1,128], index: 2, kind: input, shape index: {}]   ;;  %s310_s3 = inlined_call_operand.hbm [shape: f32[2,128], index: 3, kind: output, shape index: {}]  }
   0x1   :  { %9 = vsyncpa [#allocation6], 0 }
   0x2   :  { %10 = vsyncpa [#allocation4], 0  ;;  %s263_s12 = smov [#allocation2]  }
   0x3   :  { %s16_s13 = sshll.u32 %s263_s12, 4  ;;  %s17_s13 = int_to_ptr.vmem [resolvable:$true] %s16_s13 }
   0x4   :  { %s205_s14 = scalar_lea.vmem %s17_s13, 256  ;;  %p210_p1 = scmp.lt.s32.totalorder %s17_s13, %s17_s13 }
   0x5   :  { %p206_p0 = scmp.ne.s32.totalorder %s17_s13, %s205_s14  ;;  %p211_p2 = scmp.lt.s32.totalorder %s205_s14, %s205_s14 }
   0x7   :  { %p212_p3 = por %p211_p2, %p210_p1 }
   0x9   :  { %p213_p4 = pnand %p212_p3, %p206_p0 }
   0xb   :  { %216 = shalt.err (!%p213_p4)
}
   0xc   :  { %s264_s15 = smov 128   ;;  %s265_s16 = smov 8  }
   0xd   :  { %22 = dma.hbm_to_vmem [thread:$0]  %s307_s0, 256, %s17_s13, [#allocation3], %s264_s15, %s264_s15, %s265_s16  }
   0xe   :  { %s266_s19 = smov [#allocation5]  }
   0xf   :  { %s29_s20 = sshll.u32 %s266_s19, 4  ;;  %s30_s20 = int_to_ptr.vmem [resolvable:$true] %s29_s20 }
  0x10   :  { %s225_s21 = scalar_lea.vmem %s30_s20, 64  ;;  %p230_p6 = scmp.lt.s32.totalorder %s30_s20, %s30_s20 }
  0x11   :  { %p226_p5 = scmp.ne.s32.totalorder %s30_s20, %s225_s21  ;;  %p231_p7 = scmp.lt.s32.totalorder %s225_s21, %s225_s21 }
  0x13   :  { %p232_p8 = por %p231_p7, %p230_p6 }
  0x15   :  { %p233_p9 = pnand %p232_p8, %p226_p5 }
  0x17   :  { %236 = shalt.err (!%p233_p9)
}
  0x18   :  { %32 = dma.hbm_to_vmem [thread:$0]  %s308_s1, 64, %s30_s20, [#allocation6]  }
  0x19   :  { %257 = dma.done.wait [#allocation3], 256  }
  0x1a   :  { %258 = vsyncadd [#allocation3], 4294967040 }
  0x1b   :  { %259 = dma.done.wait [#allocation6], 64  }
  0x1c   :  { %260 = vsyncadd [#allocation6], 4294967232  ;;  %vm49_vm0 = vcmask 1043456   ;;  %v41_v0 = vld [vmem:[#allocation2] sm:$0xff]  ;;  %v42_v1 = vld [vmem:[#allocation2 + $0x8] sm:$0xff]  ;;  %v267_v11 = vmov 0.0   ;;  %v73_v12 = vlaneseq }
  0x1d   :  { %v45_v2 = vcombine.high %v41_v0, %v41_v0  ;;  %v50_v3 = vsel %vm49_vm0, %v41_v0, 0.0  ;;  %v46_v4 = vcombine.high %v42_v1, %v42_v1  ;;  %v55_v6 = vsel %vm49_vm0, %v42_v1, 0.0  ;;  %v63_v10 = vld [vmem:[#allocation5] sm:$0xf]  ;;  %183 = vmatprep.subr.mxu0 %v267_v11  ;;  %v178_v23 = vld [vmem:[%s309_s2] ss:$0 sm:$0xff] }
  0x1e   :  { %vm268_vm1 = vmmov 0   ;;  %184 = vmatpush3.msk.msra.mxu0 %vm49_vm0, %v63_v10  ;;  %v74_v13 = vand.u32 127, %v73_v12  ;;  %v76_v14 = vshrl.u32 %v73_v12, 7  ;;  %vm83_vm2 = vcmask 1041409   ;;  %s269_s24 = smov [#allocation7]  }
  0x1f   :  { %v51_v5 = vsel %vm49_vm0, %v45_v2, 0.0  ;;  %v56_v7 = vsel %vm49_vm0, %v46_v4, 0.0  ;;  %185 = vmatprep.mubr.msk.f32.mxu0 %vm268_vm1, %v267_v11  ;;  %vm85_vm3 = vcmask 31744   ;;  %s168_s25 = sshll.u32 %s269_s24, 4  ;;  %s169_s25 = int_to_ptr.vmem [resolvable:$true] %s168_s25 }
  0x20   :  { %v52_v8 = vadd.f32 %v51_v5, %v50_v3  ;;  %v57_v9 = vadd.f32 %v56_v7, %v55_v6  ;;  %v77_v16 = vsub.s32 %v74_v13, %v76_v14  ;;  %s237_s26 = scalar_lea.vmem %s169_s25, 32  ;;  %p242_p11 = scmp.lt.s32.totalorder %s169_s25, %s169_s25 }
  0x21   :  { %p238_p10 = scmp.ne.s32.totalorder %s169_s25, %s237_s26  ;;  %p243_p12 = scmp.lt.s32.totalorder %s237_s26, %s237_s26 }
  0x22   :  { %53 = vadd.xlane.f32.xlu0 %v52_v8 }
  0x23   :  { %p244_p13 = por %p243_p12, %p242_p11 }
  0x25   :  { %p245_p0 = pnand %p244_p13, %p238_p10 }
  0x26   :  { %58 = vadd.xlane.f32.xlu0 %v57_v9 }
  0xab   :  { %v54_v15 = vpop.xlane.xlu0 %53 }
  0xac   :  { %v61_v17 = vmul.f32 0.00390625, %v54_v15 }
  0xae   :  { %v78_v20 = vrot.slane %v61_v17, %v77_v16 }
  0xaf   :  { %v59_v18 = vpop.xlane.xlu0 %58 }
  0xb0   :  { %v62_v19 = vmul.f32 0.00390625, %v59_v18 }
  0xb2   :  { %v82_v21 = vrot.slane %v62_v19, %v77_v16 }
  0xb4   :  { %v84_v22 = vsel %vm83_vm2, %v82_v21, %v78_v20 }
  0xb5   :  { %186 = vmatmul.mubr.msk.f32.vlgmr.msra.gmra.mxu0 %vm85_vm3, %v84_v22 }
 0x175   :  { %v157_v24 = vpop.f32.mrf.mxu0 }
 0x176   :  { %v158_v25 = vadd.f32 %v178_v23, %v157_v24 }
 0x177   :  { %v187_v26 = vpop.f32.mrf.mxu0 }
 0x178   :  { %161 = vst [vmem:[#allocation7] sm:$0x3] %v158_v25 }
 0x179   :  { %248 = shalt.err (!%p245_p0)
}
 0x17a   :  { %171 = dma.vmem_to_hbm [thread:$0]  %s169_s25, 32, %s310_s3, [#allocation4]  }
 0x17b   :  { %261 = dma.done.wait [#allocation4], 32  }
 0x17c   :  { %262 = vsyncadd [#allocation4], 4294967264 }
 0x17d   :  { %175 = vsyncpa [#allocation3], 1 }
 0x17e   :  { %176 = vsyncpa [#allocation6], 1 }
 0x17f   :  { %177 = vsyncpa [#allocation4], 1 }

</bundles_post_ra>
